<compile_context>
chip_gen: v7x
topology: tpu7x:2x2x1
jax: 0.10.0
libtpu: 0.0.40
codegen_flags: <defaults>
</compile_context>

<pallas_src>
import functools

import jax
import jax.numpy as jnp
from jax import lax
from jax.experimental import pallas as pl
from jax.experimental.pallas import tpu as pltpu


def se_kernel(x_ref, w1_ref, w2_ref, o_ref, *, hw_true, chunk):
    """x_ref/o_ref: (1, C, HWp); w1_ref: (Cr, C); w2_ref: (C, Cr)."""
    C = x_ref.shape[1]
    hw_pad = x_ref.shape[2]
    n_chunks = hw_pad // chunk
    unroll = n_chunks <= 8

    # ---- Pass 1: squeeze (global average pool), streamed over lane chunks.
    # Pad lanes are zero, so summing the padded slab and dividing by the true
    # H*W gives the exact mean.
    def pool_body(i, acc):
        start = pl.multiple_of(i * chunk, 128)
        blk = x_ref[0, :, pl.ds(start, chunk)].astype(jnp.float32)   # (C, chunk)
        return acc + jnp.sum(blk, axis=-1, keepdims=True)

    pooled = lax.fori_loop(0, n_chunks, pool_body,
                           jnp.zeros((C, 1), jnp.float32), unroll=unroll)
    pooled = pooled * (1.0 / hw_true)                                # (C, 1)

    # ---- Excitation: fc1 (1x1 conv, no bias) + ReLU, fc2 + sigmoid.
    h = jnp.dot(w1_ref[...].astype(jnp.float32), pooled,
                preferred_element_type=jnp.float32)                  # (Cr, 1)
    h = jnp.maximum(h, 0.0)
    s = jnp.dot(w2_ref[...].astype(jnp.float32), h,
                preferred_element_type=jnp.float32)                  # (C, 1)
    s = jax.nn.sigmoid(s)

    # ---- Pass 2: scale, re-streaming the slab chunk-by-chunk.  Each store
    # is (C, chunk) with chunk a multiple of 128 -> unmasked lane-dense vst.
    def scale_body(i, carry):
        start = pl.multiple_of(i * chunk, 128)
        blk = x_ref[0, :, pl.ds(start, chunk)].astype(jnp.float32)
        o_ref[0, :, pl.ds(start, chunk)] = (blk * s).astype(o_ref.dtype)
        return carry

    lax.fori_loop(0, n_chunks, scale_body, 0, unroll=unroll)


def _vmem_limit_bytes(slab_bytes, weight_bytes):
    """2x in + 2x out slab double-buffers + weights + headroom, clamped to HW."""
    needed = 4 * slab_bytes + 2 * weight_bytes + (4 << 20)
    try:
        cap = int(pltpu.get_tpu_info().vmem_capacity_bytes)
    except Exception:
        cap = 64 << 20  # conservative (v7x physical VMEM per TC)
    # Never below the common 32 MiB scoped default; leave ~10% of physical
    # VMEM as headroom for compiler-internal scratch.
    return int(min(max(needed, 32 << 20), int(cap * 0.9)))


def se_module(x_nchw, w1, w2):
    """x_nchw: (N, C, H, W); w1: (C//r, C); w2: (C, C//r)."""
    N, C, H, W = x_nchw.shape
    HW = H * W
    Cr = w1.shape[0]

    # Lane-dense layout: pad the spatial axis to a multiple of 128.
    HWp = ((HW + 127) // 128) * 128
    x_flat = x_nchw.reshape(N, C, HW)
    if HWp != HW:
        x_flat = jnp.pad(x_flat, ((0, 0), (0, 0), (0, HWp - HW)))

    # Largest chunk (multiple of 128 lanes, capped at 1024) dividing HWp.
    chunk = 128
    for cand in (1024, 512, 256, 128):
        if HWp % cand == 0:
            chunk = cand
            break

    slab_bytes = C * HWp * x_flat.dtype.itemsize
    weight_bytes = (w1.size * w1.dtype.itemsize) + (w2.size * w2.dtype.itemsize)

    kernel = functools.partial(se_kernel, hw_true=HW, chunk=chunk)

    out_flat = pl.pallas_call(
        kernel,
        out_shape=jax.ShapeDtypeStruct((N, C, HWp), x_nchw.dtype),
        grid_spec=pltpu.PrefetchScalarGridSpec(
            num_scalar_prefetch=0,
            grid=(N,),
            in_specs=[
                pl.BlockSpec((1, C, HWp), lambda n: (n, 0, 0)),
                pl.BlockSpec((Cr, C), lambda n: (0, 0)),
                pl.BlockSpec((C, Cr), lambda n: (0, 0)),
            ],
            out_specs=pl.BlockSpec((1, C, HWp), lambda n: (n, 0, 0)),
        ),
        compiler_params=pltpu.CompilerParams(
            dimension_semantics=("parallel",),
            vmem_limit_bytes=_vmem_limit_bytes(slab_bytes, weight_bytes),
        ),
    )(x_flat, w1, w2)

    out = out_flat if HWp == HW else out_flat[:, :, :HW]
    return out.reshape(N, C, H, W)


def se_module_ref(x, w1, w2):
    """Pure-JAX reference matching the PyTorch forward."""
    pooled = jnp.mean(x, axis=(2, 3), keepdims=True)            # (N, C, 1, 1)
    h = jnp.einsum("rc,nchw->nrhw", w1, pooled)                  # fc1 (1x1 conv)
    h = jnp.maximum(h, 0.0)
    s = jnp.einsum("cr,nrhw->nchw", w2, h)                       # fc2 (1x1 conv)
    s = jax.nn.sigmoid(s)
    return x * s


if __name__ == "__main__":
    reduction = 4
    # Two cases: HW not 128-aligned (exercises the zero-pad path) and aligned.
    for (N, C, H, W) in [(2, 32, 14, 14), (2, 32, 16, 16)]:
        Cr = C // reduction

        key = jax.random.PRNGKey(0)
        kx, k1, k2 = jax.random.split(key, 3)
        x = jax.random.normal(kx, (N, C, H, W), dtype=jnp.float32)
        # Deterministic init of the 1x1 conv weights (bias=False in the module).
        w1 = jax.random.normal(k1, (Cr, C), dtype=jnp.float32) * 0.1
        w2 = jax.random.normal(k2, (C, Cr), dtype=jnp.float32) * 0.1

        out = jax.block_until_ready(se_module(x, w1, w2))
        ref = se_module_ref(x, w1, w2)
        assert out.shape == (N, C, H, W)
        assert jnp.allclose(out, ref, atol=1e-5, rtol=1e-5), (
            f"mismatch at {(N, C, H, W)}: max err "
            f"{jnp.max(jnp.abs(out - ref))}"
        )

    print("KERNEL_OK")
</pallas_src>

<mosaic_0001>
module attributes {stable_mosaic.version = 11 : i64} {
  func.func @se_kernel(%arg0: i32, %arg1: memref<1x32x256xf32, #tpu.memory_space<vmem>>, %arg2: memref<8x32xf32, #tpu.memory_space<vmem>>, %arg3: memref<32x8xf32, #tpu.memory_space<vmem>>, %arg4: memref<1x32x256xf32, #tpu.memory_space<vmem>>) attributes {dimension_semantics = [#tpu.dimension_semantics<parallel>], iteration_bounds = array<i64: 2>, scalar_prefetch = 0 : i64, scratch_operands = 0 : i64, tpu.core_type = #tpu.core_type<tc>, window_params = [{transform_indices = @transform_0, window_bounds = array<i64: 1, 32, 256>}, {pipeline_mode = #tpu.pipeline_mode<synchronous>, transform_indices = @transform_1, window_bounds = array<i64: 8, 32>}, {pipeline_mode = #tpu.pipeline_mode<synchronous>, transform_indices = @transform_2, window_bounds = array<i64: 32, 8>}, {transform_indices = @transform_3, window_bounds = array<i64: 1, 32, 256>}]} {
    %cst = arith.constant 0.000000e+00 : f32
    %0 = vector.broadcast %cst : f32 to vector<32x1xf32>
    %c0_i32 = arith.constant 0 : i32
    %c256_i32 = arith.constant 256 : i32
    %1 = arith.muli %c0_i32, %c256_i32 : i32
    %2 = tpu.assume_multiple %1, 128 : i32
    %c0 = arith.constant 0 : index
    %c0_0 = arith.constant 0 : index
    %3 = arith.index_cast %2 : i32 to index
    %4 = vector.load %arg1[%c0, %c0_0, %3] : memref<1x32x256xf32, #tpu.memory_space<vmem>>, vector<1x32x256xf32>
    %5 = vector.shape_cast %4 : vector<1x32x256xf32> to vector<32x256xf32>
    %cst_1 = arith.constant dense<0.000000e+00> : vector<32xf32>
    %6 = vector.multi_reduction <add>, %5, %cst_1 [1] : vector<32x256xf32> to vector<32xf32>
    %7 = vector.shape_cast %6 : vector<32xf32> to vector<32x1xf32>
    %8 = arith.addf %0, %7 : vector<32x1xf32>
    %c1_i32 = arith.constant 1 : i32
    %cst_2 = arith.constant 0.00510204071 : f32
    %9 = vector.broadcast %cst_2 : f32 to vector<32x1xf32>
    %10 = arith.mulf %8, %9 : vector<32x1xf32>
    %c0_3 = arith.constant 0 : index
    %c0_4 = arith.constant 0 : index
    %11 = vector.load %arg2[%c0_3, %c0_4] : memref<8x32xf32, #tpu.memory_space<vmem>>, vector<8x32xf32>
    %cst_5 = arith.constant dense<0.000000e+00> : vector<8x1xf32>
    %12 = tpu.matmul %11, %10, %cst_5 {dimension_numbers = #tpu.dot_dimension_numbers<[1], [0], [0], [1], [0, 0, 1, 1], [], []>} : vector<8x32xf32>, vector<32x1xf32>, vector<8x1xf32> -> vector<8x1xf32>
    %cst_6 = arith.constant 0.000000e+00 : f32
    %13 = vector.broadcast %cst_6 : f32 to vector<8x1xf32>
    %14 = arith.maximumf %12, %13 : vector<8x1xf32>
    %c0_7 = arith.constant 0 : index
    %c0_8 = arith.constant 0 : index
    %15 = vector.load %arg3[%c0_7, %c0_8] : memref<32x8xf32, #tpu.memory_space<vmem>>, vector<32x8xf32>
    %cst_9 = arith.constant dense<0.000000e+00> : vector<32x1xf32>
    %16 = tpu.matmul %15, %14, %cst_9 {dimension_numbers = #tpu.dot_dimension_numbers<[1], [0], [0], [1], [0, 0, 1, 1], [], []>} : vector<32x8xf32>, vector<8x1xf32>, vector<32x1xf32> -> vector<32x1xf32>
    %17 = arith.negf %16 : vector<32x1xf32>
    %18 = math.exp %17 : vector<32x1xf32>
    %cst_10 = arith.constant 1.000000e+00 : f32
    %19 = vector.broadcast %cst_10 : f32 to vector<32x1xf32>
    %20 = arith.addf %19, %18 : vector<32x1xf32>
    %21 = arith.divf %19, %20 : vector<32x1xf32>
    %c0_i32_11 = arith.constant 0 : i32
    %c256_i32_12 = arith.constant 256 : i32
    %22 = arith.muli %c0_i32_11, %c256_i32_12 : i32
    %23 = tpu.assume_multiple %22, 128 : i32
    %c0_13 = arith.constant 0 : index
    %c0_14 = arith.constant 0 : index
    %24 = arith.index_cast %23 : i32 to index
    %25 = vector.load %arg1[%c0_13, %c0_14, %24] : memref<1x32x256xf32, #tpu.memory_space<vmem>>, vector<1x32x256xf32>
    %26 = vector.shape_cast %25 : vector<1x32x256xf32> to vector<32x256xf32>
    %27 = vector.broadcast %21 : vector<32x1xf32> to vector<32x256xf32>
    %28 = arith.mulf %26, %27 : vector<32x256xf32>
    %c0_15 = arith.constant 0 : index
    %c0_16 = arith.constant 0 : index
    %29 = arith.index_cast %23 : i32 to index
    %30 = vector.load %arg4[%c0_15, %c0_16, %29] : memref<1x32x256xf32, #tpu.memory_space<vmem>>, vector<1x32x256xf32>
    %31 = vector.shape_cast %30 : vector<1x32x256xf32> to vector<32x256xf32>
    %32 = vector.shape_cast %28 : vector<32x256xf32> to vector<1x32x256xf32>
    tpu.vector_store %arg4[%c0_15, %c0_16, %29], %32 {strides = array<i32>} : memref<1x32x256xf32, #tpu.memory_space<vmem>>, vector<1x32x256xf32>,
    %c1_i32_17 = arith.constant 1 : i32
    return
  }
  func.func @transform_0(%arg0: i32) -> (i32, i32, i32) {
    %c0_i32 = arith.constant 0 : i32
    %c0_i32_0 = arith.constant 0 : i32
    %c0_i32_1 = arith.constant 0 : i32
    return %arg0, %c0_i32, %c0_i32_0 : i32, i32, i32
  }
  func.func @transform_1(%arg0: i32) -> (i32, i32) {
    %c0_i32 = arith.constant 0 : i32
    %c0_i32_0 = arith.constant 0 : i32
    %c0_i32_1 = arith.constant 0 : i32
    return %c0_i32, %c0_i32_0 : i32, i32
  }
  func.func @transform_2(%arg0: i32) -> (i32, i32) {
    %c0_i32 = arith.constant 0 : i32
    %c0_i32_0 = arith.constant 0 : i32
    %c0_i32_1 = arith.constant 0 : i32
    return %c0_i32, %c0_i32_0 : i32, i32
  }
  func.func @transform_3(%arg0: i32) -> (i32, i32, i32) {
    %c0_i32 = arith.constant 0 : i32
    %c0_i32_0 = arith.constant 0 : i32
    %c0_i32_1 = arith.constant 0 : i32
    return %arg0, %c0_i32, %c0_i32_0 : i32, i32, i32
  }
}

</mosaic_0001>

<bundles_post_ra>
// kernel: tpu_custom_call.1
= control target key start
LH: loop header
LB: loop body
LE: loop exit
PB: predicated region body
PF: predicated region fallthrough
CT: control target
= control target key end

     0   :  { %8 = vsyncpa [#allocation3], 0  ;;  %s1015_s0 = inlined_call_operand.hbm [shape: f32[2,32,256], index: 0, kind: input, shape index: {}]   ;;  %s1016_s1 = inlined_call_operand.vmem [shape: f32[8,32], index: 1, kind: input, shape index: {}]   ;;  %s1017_s2 = inlined_call_operand.vmem [shape: f32[32,8], index: 2, kind: input, shape index: {}]   ;;  %s1018_s3 = inlined_call_operand.hbm [shape: f32[2,32,256], index: 3, kind: output, shape index: {}]  }
   0x1   :  { %10 = vsyncpa [#allocation3 + $0x1], 0 }
   0x2   :  { %11 = vsyncpa [#allocation4], 0 }
   0x3   :  { %13 = vsyncpa [#allocation4 + $0x1], 0  ;;  %s802_s12 = smov 0   ;;  %s804_s13 = smov 0  }
   0x4   :  { %s806_s14 = smov 0   ;;  %s808_s15 = smov 0  }
   0x5 LB: > { %s823_s16 = sadd.s32 4294967295, %s770_s15   ;;  %s542_s17 = sadd.s32 4294967294, %s770_s15   ;;  %s770_s15 = sphi %s808_s15, %s1031_s15   ;;  %s766_s14 = sphi %s806_s14, %s1030_s14   ;;  %s762_s13 = sphi %s804_s13, %s1029_s13   ;;  %s758_s12 = sphi %s802_s12, %s1028_s12  }
   0x6   : > { %s827_s18 = sadd.s32 1, %s770_s15   ;;  %s26_s19 = sadd.s32 1, %s766_s14 }
   0x7   : > { %s23_s20 = ssub.s32 %s770_s15, %s827_s18  ;;  %p33_p0 = scmp.ne.s32.totalorder %s766_s14, %s762_s13 }
   0x8   : > { %p24_p1 = scmp.eq.s32.totalorder %s23_s20, 0  ;;  %p34_p2 = scmp.eq.s32.totalorder %s770_s15, 0 }
   0x9   : > { %p39_p3 = scmp.ne.s32.totalorder %s762_s13, %s758_s12  ;;  %p40_p4 = scmp.eq.s32.totalorder %s823_s16, 0 }
   0xa   : > { %s839_s21 = scalar_select %p24_p1, %s766_s14, %s26_s19  }
   0xb   : > { %p841_p5 = por %p34_p2, %p33_p0  ;;  %p845_p6 = por %p40_p4, %p39_p3 }
   0xc   : > { %p105_p7 = scmp.eq.s32.totalorder %s823_s16, 1  ;;  %p111_p8 = scmp.eq.s32.totalorder %s542_s17, 1 }
   0xd   : > { %p614_p10 = scmp.lt.s32.totalorder %s770_s15, 2  ;;  %s137_s26 = sand.u32 1, %s766_s14  }
   0xe   : > { %p852_p11 = por %p105_p7, %p33_p0  ;;  %p856_p12 = por %p111_p8, %p39_p3 }
   0xf   : > { %s565_s27 = sshll.u32 %s770_s15, 10  ;;  %s545_s28 = sshll.u32 %s137_s26, 6 }
  0x10   : > { %s1022_s24 = scalar_select %p852_p11, 1, 0 }
  0x11   : > { %s1023_s25 = scalar_select %p856_p12, 1, 0 }
  0x12   : > { %s865_s4 = scalar_lea.hbm %s1015_s0, %s565_s27  ;;  %s141_s5 = scalar_lea.vmem [#allocation2], %s545_s28 }
  0x13   : > { %s148_s6 = sshll.u32 %s141_s5, 4  ;;  %p869_p13 = pnand %p614_p10, %p841_p5  ;;  %s873_s6 = int_to_ptr.vmem [resolvable:$true] %s148_s6 }
  0x14   : > { %s875_s8 = scalar_lea.sflag [#allocation3], %s137_s26  ;;  %s674_s9 = scalar_lea.hbm %s865_s4, 1024 }
  0x15   : > { %p675_p0 = scmp.ne.s32.totalorder %s865_s4, %s674_s9  ;;  %p676_p1 = pneg %p869_p13 }
  0x16   : > { %s679_s17 = scalar_lea.hbm %s1015_s0, 2048  ;;  %p680_p4 = scmp.lt.u32.totalorder %s865_s4, %s1015_s0 }
  0x17   : > { %p677_p2 = pnand %p676_p1, %p675_p0  ;;  %p681_p5 = scmp.lt.u32.totalorder %s679_s17, %s674_s9 }
  0x18   : > { %p683_p8 = scmp.lt.u32.totalorder %s674_s9, %s865_s4 }
  0x19   : > { %p678_p3 = pneg %p677_p2  ;;  %p682_p7 = por %p681_p5, %p680_p4 }
  0x1b   : > { %p684_p10 = por %p683_p8, %p682_p7 }
  0x1d   : > { %p685_p9 = pnand %p684_p10, %p678_p3 }
  0x1f   : > { %688 = shalt.err (!%p685_p9)
}
  0x20   : > { %s689_s22 = scalar_lea.vmem %s873_s6, 1024  ;;  %s772_s26 = smov [#allocation2]  }
  0x21   : > { %p690_p0 = scmp.ne.s32.totalorder %s873_s6, %s689_s22  ;;  %s694_s27 = sshll.u32 %s772_s26, 4  ;;  %s695_s27 = int_to_ptr.vmem [resolvable:$false] %s694_s27 }
  0x22   : > { %s696_s28 = scalar_lea.vmem %s695_s27, 2048  ;;  %p697_p11 = scmp.lt.s32.totalorder %s873_s6, %s695_s27 }
  0x23   : > { %p692_p2 = pnand %p690_p0, %p676_p1  ;;  %p698_p4 = scmp.lt.s32.totalorder %s696_s28, %s689_s22 }
  0x25   : > { %p693_p12 = pneg %p692_p2  ;;  %p699_p5 = por %p698_p4, %p697_p11 }
  0x27   : > { %p700_p7 = pnand %p699_p5, %p693_p12 }
  0x29   : > { %703 = shalt.err (!%p700_p7)
}
  0x2a   : > { %s773_s29 = smov 256   ;;  %s774_s30 = smov 16  }
  0x2b   : > { %609 = dma.hbm_to_vmem [thread:$0]  (!%p869_p13), %s865_s4, 1024, %s873_s6, %s875_s8, %s773_s29, %s773_s29, %s774_s30  }
  0x2c   : > { %p548_p9 = scmp.ge.s32.totalorder %s770_s15, 1  ;;  %p156_p1 = scmp.lt.s32.totalorder %s770_s15, 3 }
  0x2e   : > { %p157_p3 = pnand %p548_p9, %p156_p1 }
  0x2f   : > { %s906_s5 = sand.u32 (!%p157_p3), 1, %s762_s13  }
  0x30   : > { %160 = sbr.rel (%p157_p3) target bundleno = 825 (0x339), region = 32  ;;  %s549_s9 = sshll.u32 (!%p157_p3), %s906_s5, 6 }
  0x31   : > { %s163_s10 = scalar_lea.sflag (!%p157_p3), [#allocation3], %s906_s5  ;;  %s166_s11 = scalar_lea.vmem (!%p157_p3), [#allocation2], %s549_s9 }
  0x37   : > { %749 = dma.done.wait (%p845_p6), %s163_s10, 1024  }
  0x38   : > { %751 = vsyncadd (%p845_p6), %s163_s10, 4294966272  ;;  %v916_v0 = vld [vmem:[%s166_s11 + $0x20] sm:$0xff]  ;;  %v918_v1 = vld [vmem:[%s166_s11 + $0x28] sm:$0xff]  ;;  %v775_v12 = vmov 0.0|0.0   ;;  %vm776_vm0 = vmmov 0   ;;  %v777_v13 = vmov 0.0  }
  0x39   : > { %v920_v2 = vld [vmem:[%s166_s11] sm:$0xff]  ;;  %v203_v3 = vadd.f32 %v918_v1, %v916_v0  ;;  %v924_v4 = vld [vmem:[%s166_s11 + $0x8] sm:$0xff]  ;;  %v926_v5 = vld [vmem:[%s166_s11 + $0x30] sm:$0xff]  ;;  %596 = vmatprep.subr.bf16.mxu0 %v775_v12  ;;  %585 = vmatprep.mubr.msk.f32.mxu0 %vm776_vm0, %v777_v13  ;;  %vm218_vm1 = vcmask 261120   ;;  %vm297_vm2 = vcmask 64512   ;;  %v778_v32 = vmov 0  }
  0x3a   : > { %v928_v6 = vld [vmem:[%s166_s11 + $0x38] sm:$0xff]  ;;  %v197_v7 = vadd.f32 %v924_v4, %v920_v2  ;;  %v932_v8 = vld [vmem:[%s166_s11 + $0x10] sm:$0xff]  ;;  %v217_v24 = vld [vmem:[%s1016_s1] sm:$0xff]  ;;  %657 = vset.pattern.permute.xlu1 %v778_v32  ;;  %656 = vset.pattern.permute.xlu0 %v778_v32  ;;  %s188_s27 = scalar_lea.vmem [#allocation5], %s549_s9  ;;  %s566_s29 = sshll.u32 %s823_s16, 10 }
  0x3b   : > { %v934_v9 = vld [vmem:[%s166_s11 + $0x18] sm:$0xff]  ;;  %204 = vadd.xlane.f32.xlu1 %v203_v3  ;;  %v206_v10 = vadd.f32 %v928_v6, %v926_v5  ;;  %v293_v25 = vld [vmem:[%s1017_s2] sm:$0xff]  ;;  %v294_v29 = vld [vmem:[%s1017_s2 + $0x8] sm:$0xff]  ;;  %s469_s28 = sshll.u32 %s188_s27, 4  ;;  %s969_s10 = scalar_lea.hbm %s1018_s3, %s566_s29  ;;  %s964_s28 = int_to_ptr.vmem [resolvable:$true] %s469_s28 }
  0x3c   : > { %198 = vadd.xlane.f32.xlu0 %v197_v7  ;;  %v200_v11 = vadd.f32 %v934_v9, %v932_v8  ;;  %590 = vmatprep.mubr.msk.f32.mxu1 %vm297_vm2, %v293_v25  ;;  %v295_v30 = vld [vmem:[%s1017_s2 + $0x10] sm:$0xff]  ;;  %v296_v31 = vld [vmem:[%s1017_s2 + $0x18] sm:$0xff]  ;;  %s456_s16 = scalar_lea.sflag [#allocation4], %s906_s5  ;;  %s704_s11 = scalar_lea.vmem %s964_s28, 1024 }
  0x3d   : > { %p705_p6 = scmp.ne.s32.totalorder %s964_s28, %s704_s11  ;;  %p1025_p11 = scmp.ne.s32.totalorder %s1022_s24, 0 }
  0x3e   : > { %s779_s23 = smov [#allocation5]  }
  0x3f   : > { %207 = vadd.xlane.f32.xlu1 %v206_v10  ;;  %p706_p12 = pnand %p705_p6, %p1025_p11  ;;  %s708_s4 = sshll.u32 %s779_s23, 4  ;;  %s709_s4 = int_to_ptr.vmem [resolvable:$false] %s708_s4 }
  0x40   : > { %201 = vadd.xlane.f32.xlu0 %v200_v11  ;;  %s710_s6 = scalar_lea.vmem %s709_s4, 2048  ;;  %p711_p8 = scmp.lt.s32.totalorder %s964_s28, %s709_s4 }
  0x41   : > { %p707_p13 = pneg %p706_p12  ;;  %p712_p10 = scmp.lt.s32.totalorder %s710_s6, %s704_s11 }
  0x43   : > { %p713_p0 = por %p712_p10, %p711_p8 }
  0x45   : > { %p714_p2 = pnand %p713_p0, %p707_p13 }
  0xc8   : > { %v205_v14 = vpop.xlane.xlu1 %204 }
  0xc9   : > { %v199_v15 = vpop.xlane.xlu0 %198  ;;  %v215_v20 = vmul.f32 0.0051020407, %v205_v14 }
  0xca   : > { %v213_v18 = vmul.f32 0.0051020407, %v199_v15 }
  0xcc   : > { %v208_v16 = vpop.xlane.xlu1 %207 }
  0xcd   : > { %v202_v17 = vpop.xlane.xlu0 %201  ;;  %v216_v21 = vmul.f32 0.0051020407, %v208_v16 }
  0xce   : > { %v214_v19 = vmul.f32 0.0051020407, %v202_v17 }
  0xcf   : > { %v600_v23 = vpack.c.bf16 %v216_v21, %v215_v20 }
  0xd0   : > { %v597_v22 = vpack.c.bf16 %v214_v19, %v213_v18 }
  0xd2   : > { %598 = vmatpush3.bf16.msra.mxu0 %v597_v22 }
  0xd3   : > { %599 = vmatprep.subr.bf16.mxu0 %v775_v12 }
  0xd6   : > { %601 = vmatpush3.bf16.msra.mxu0 %v600_v23 }
  0xd9   : > { %586 = vmatmul.mubr.msk.f32.vlgmr.msra.gmra.mrb[0].mxu0 %vm218_vm1, %v217_v24 }
 0x1ac   : > { %v288_v26 = vpop.f32.mrb[0].mxu0 }
 0x1ad   : > { %v292_v27 = vmax.f32 %v288_v26, 0.0  ;;  %v587_v28 = vpop.f32.mrb[1].mxu0 }
 0x1af   : > { %588 = vmatprep.subr.mxu1 %v292_v27 }
 0x1b0   : > { %589 = vmatpush3.msra.mxu1 %v292_v27 }
 0x1b1   : > { %591 = vmatmul.mubr.msk.f32.vlgmr.msra.gmra.mrb[0].mxu1 %vm297_vm2, %v294_v29 }
 0x1b2   : > { %593 = vmatprep.mubr.msk.f32.mxu1 %vm297_vm2, %v295_v30 }
 0x1b5   : > { %594 = vmatmul.mubr.msk.f32.gmra.mrb[2].mxu1 %vm297_vm2, %v296_v31 }
 0x284   : > { %v592_v33 = vpop.f32.mrb[0].mxu1 }
 0x285   : > { %v557_v34 = vmul.f32 -1.442695, %v592_v33  ;;  %v376_v35 = vpop.f32.mrb[1].mxu1 }
 0x286   : > { %v556_v36 = vmul.f32 -1.442695, %v376_v35 }
 0x287   : > { %658 = vpow2.f32 %v557_v34 }
 0x288   : > { %660 = vpow2.f32 %v556_v36  ;;  %v595_v37 = vpop.f32.mrb[2].mxu1 }
 0x289   : > { %v559_v38 = vmul.f32 -1.442695, %v595_v37  ;;  %v386_v39 = vpop.f32.mrb[3].mxu1 }
 0x28a   : > { %v558_v40 = vmul.f32 -1.442695, %v386_v39 }
 0x28b   : > { %662 = vpow2.f32 %v559_v38 }
 0x28c   : > { %664 = vpow2.f32 %v558_v40 }
 0x291   : > { %v659_v41 = vpop.eup %658 }
 0x292   : > { %v661_v42 = vpop.eup %660  ;;  %v408_v43 = vadd.f32 1.0, %v659_v41 }
 0x293   : > { %v407_v44 = vadd.f32 1.0, %v661_v42 }
 0x294   : > { %666 = vrcp.f32 %v408_v43 }
 0x295   : > { %v663_v45 = vpop.eup %662  ;;  %668 = vrcp.f32 %v407_v44 }
 0x296   : > { %v665_v46 = vpop.eup %664  ;;  %v410_v48 = vadd.f32 1.0, %v663_v45 }
 0x297   : > { %v409_v47 = vadd.f32 1.0, %v665_v46 }
 0x299   : > { %670 = vrcp.f32 %v409_v47 }
 0x29a   : > { %672 = vrcp.f32 %v410_v48 }
 0x29e   : > { %v667_v49 = vpop.eup %666 }
 0x29f   : > { %v669_v50 = vpop.eup %668  ;;  %426 = vperm.xlu1 %657, %v667_v49  }
 0x2a0   : > { %421 = vperm.xlu0 %656, %v669_v50  }
 0x2a3   : > { %v671_v51 = vpop.eup %670 }
 0x2a4   : > { %431 = vperm.xlu1 %657, %v671_v51   ;;  %v673_v52 = vpop.eup %672 }
 0x2a8   : > { %436 = vperm.xlu1 %657, %v673_v52  }
 0x31e   : > { %v427_v53 = vpop.permute.xlu1 %426 }
 0x31f   : > { %v441_v54 = vmul.f32 %v427_v53, %v932_v8  ;;  %v442_v55 = vmul.f32 %v427_v53, %v934_v9  ;;  %v422_v56 = vpop.permute.xlu0 %421 }
 0x320   : > { %v439_v57 = vmul.f32 %v422_v56, %v920_v2  ;;  %v440_v58 = vmul.f32 %v422_v56, %v924_v4 }
 0x321   : > { %449 = vst [vmem:[%s188_s27 + $0x10] sm:$0xff] %v441_v54  ;;  %450 = vst [vmem:[%s188_s27 + $0x18] sm:$0xff] %v442_v55 }
 0x322   : > { %447 = vst [vmem:[%s188_s27] sm:$0xff] %v439_v57  ;;  %448 = vst [vmem:[%s188_s27 + $0x8] sm:$0xff] %v440_v58 }
 0x323   : > { %v432_v59 = vpop.permute.xlu1 %431 }
 0x324   : > { %v443_v60 = vmul.f32 %v432_v59, %v916_v0  ;;  %v444_v61 = vmul.f32 %v432_v59, %v918_v1 }
 0x326   : > { %451 = vst [vmem:[%s188_s27 + $0x20] sm:$0xff] %v443_v60  ;;  %452 = vst [vmem:[%s188_s27 + $0x28] sm:$0xff] %v444_v61 }
 0x327   : > { %v437_v62 = vpop.permute.xlu1 %436 }
 0x328   : > { %v445_v63 = vmul.f32 %v437_v62, %v926_v5  ;;  %v446_v0 = vmul.f32 %v437_v62, %v928_v6 }
 0x32a   : > { %453 = vst [vmem:[%s188_s27 + $0x30] sm:$0xff] %v445_v63  ;;  %454 = vst [vmem:[%s188_s27 + $0x38] sm:$0xff] %v446_v0 }
 0x32b   : > { %717 = shalt.err (!%p714_p2)
}
 0x32c   : > { %s718_s7 = scalar_lea.hbm %s969_s10, 1024  ;;  %s722_s19 = scalar_lea.hbm %s1018_s3, 2048 }
 0x32d   : > { %p719_p4 = scmp.ne.s32.totalorder %s969_s10, %s718_s7  ;;  %p723_p9 = scmp.lt.u32.totalorder %s969_s10, %s1018_s3 }
 0x32e   : > { %p724_p1 = scmp.lt.u32.totalorder %s722_s19, %s718_s7  ;;  %p726_p6 = scmp.lt.u32.totalorder %s718_s7, %s969_s10 }
 0x32f   : > { %p720_p5 = pnand %p719_p4, %p1025_p11 }
 0x330   : > { %p725_p3 = por %p724_p1, %p723_p9 }
 0x331   : > { %p721_p7 = pneg %p720_p5 }
 0x332   : > { %p727_p12 = por %p726_p6, %p725_p3 }
 0x334   : > { %p728_p13 = pnand %p727_p12, %p721_p7 }
 0x336   : > { %731 = shalt.err (!%p728_p13)
}
 0x337   : > { %s780_s26 = smov 256   ;;  %s781_s27 = smov 16  }
 0x338   : > { %604 = dma.vmem_to_hbm [thread:$0]  (%p1025_p11), %s964_s28, 1024, %s969_s10, %s456_s16, %s780_s26, %s780_s26, %s781_s27  }
 0x339 PF: > { %s484_s29 = sand.u32 1, %s758_s12   ;;  %p1026_p8 = scmp.ne.s32.totalorder %s1023_s25, 0 }
 0x33a   : > { %p1027_p10 = scmp.ge.s32.totalorder %s770_s15, 2  ;;  %s485_s30 = scalar_lea.sflag [#allocation4], %s484_s29 }
 0x33c   : > { %p611_p0 = pnand %p1027_p10, %p1026_p8 }
 0x33e   : > { %753 = dma.done.wait (!%p611_p0), %s485_s30, 1024  }
 0x33f   : > { %755 = vsyncadd (!%p611_p0), %s485_s30, 4294966272  ;;  %p16_p2 = scmp.ge.s32.totalorder %s827_s18, 4   ;;  %s1028_s12 = smov %s762_s13 }
 0x340   : > { %s1029_s13 = smov %s766_s14  ;;  %s1030_s14 = smov %s839_s21 }
 0x341   : > { %s1031_s15 = smov %s827_s18  ;;  %18 = sbr.rel (!%p16_p2) target bundleno = 5 (0x5), region = 77 }
 0x348   :  { %490 = vsyncpa [#allocation3], 1 }
 0x349   :  { %492 = vsyncpa [#allocation3 + $0x1], 1 }
 0x34a   :  { %493 = vsyncpa [#allocation4], 1 }
 0x34b   :  { %495 = vsyncpa [#allocation4 + $0x1], 1 }

</bundles_post_ra>
